<compile_context>
chip_gen: v7x
topology: tpu7x:2x2x1
jax: 0.10.0
libtpu: 0.0.40
codegen_flags: <defaults>
</compile_context>

<pallas_src>
import numpy as np
import jax
import jax.numpy as jnp
from jax.experimental import pallas as pl
from jax.experimental.pallas import tpu as pltpu


def _interp_matrix(n_in, n_out):
    """Dense interpolation matrix A (n_out, n_in): bilinear, align_corners=True.
    Every row sums to 1 (used for the conv/BN commutation)."""
    A = np.zeros((n_out, n_in), np.float32)
    if n_out == 1:
        A[0, 0] = 1.0
        return A
    src = np.arange(n_out, dtype=np.float64) * (n_in - 1) / (n_out - 1)
    i0 = np.clip(np.floor(src).astype(np.int64), 0, n_in - 1)
    i1 = np.clip(i0 + 1, 0, n_in - 1)
    w1 = (src - i0).astype(np.float32)
    w0 = 1.0 - w1
    rows = np.arange(n_out)
    np.add.at(A, (rows, i0), w0)
    np.add.at(A, (rows, i1), w1)
    return A


def _vmem_capacity_bytes():
    try:
        return int(pltpu.get_tpu_info().vmem_capacity_bytes)
    except Exception:
        return 64 << 20            # conservative (v7x-sized) fallback


def _pick_nb(N, Cin, Cout, H, W, H2, W2, budget_bytes):
    """Whole images per grid step.  Keeps grid >= 2 when possible (v7x has two
    TensorCores) and the per-step VMEM footprint -- including Pallas double
    buffering of every streamed/constant block plus the matmul intermediates --
    under `budget_bytes`.  Returns (nb, estimated_bytes_for_nb)."""
    def est(nb):
        bi, bo = nb * Cin, nb * Cout
        const = 4 * (bi * H2 * bi * H + bo * H2 * bo * H + W * W2)   # interp mats
        stream = 4 * ((bi + bo) * (H * W + H2 * W2))                 # in + out blocks
        interm = 4 * ((bi + bo) * H2 * (W + W2))                     # matmul temps
        return 2 * (const + stream) + interm                         # x2 double-buffer

    best_nb = 1
    for nb in range(2, N + 1):
        if N % nb:
            continue
        if N // nb < 2:            # keep >= 2 grid steps for v7x's two cores
            break
        if est(nb) > budget_bytes:
            break
        best_nb = nb
    # Note: for very large images a second (spatial) grid axis would be needed;
    # not required at this module's typical decoder shapes.
    return best_nb, est(best_nb)


def _fused_upsample_kernel(ahd_x_ref, ahd_z_ref, awt_ref, x_ref, z_ref,
                           xup_ref, cv_ref):
    # ahd_x: (Bi*H2, Bi*H) block-diag H-interp (x path); ahd_z: (Bo*H2, Bo*H)
    # awt:   (W, W2)       transposed W-interp matrix
    # x:     (Bi, H, W)    Bi = NB*Cin  raw channels of NB whole images
    # z:     (Bo, H, W)    Bo = NB*Cout conv+BN-affine channels (same images)
    # xup:   (Bi*H2, W2)   rows are (channel, h2) in NCHW order
    # cv:    (Bo*H2, W2)
    bi, h, w = x_ref.shape
    bo = z_ref.shape[0]

    # x path: two 2-D MXU matmuls (M = Bi*H >= 64 / Bi*H2 >= 128; no per-image
    # tiny batched matmuls).
    xh = jnp.dot(ahd_x_ref[...], x_ref[...].reshape(bi * h, w),
                 preferred_element_type=jnp.float32)                 # (Bi*H2, W)
    xup_ref[...] = jnp.dot(xh, awt_ref[...],
                           preferred_element_type=jnp.float32
                           ).astype(xup_ref.dtype)                   # (Bi*H2, W2)

    # conv branch: upsample the pre-scaled conv output, ReLU in the epilogue.
    zh = jnp.dot(ahd_z_ref[...], z_ref[...].reshape(bo * h, w),
                 preferred_element_type=jnp.float32)                 # (Bo*H2, W)
    zup = jnp.dot(zh, awt_ref[...], preferred_element_type=jnp.float32)
    cv_ref[...] = jnp.maximum(zup, 0.0).astype(cv_ref.dtype)         # (Bo*H2, W2)


def upsample_interpolate(x, conv_w, gamma, beta, *, scale=2, eps=1e-5):
    N, Cin, H, W = x.shape
    Cout = conv_w.shape[0]
    H2, W2 = H * scale, W * scale

    A_h = _interp_matrix(H, H2)          # np (H2, H)
    A_w = _interp_matrix(W, W2)          # np (W2, W)
    A_h_j = jnp.asarray(A_h)
    A_w_j = jnp.asarray(A_w)

    # ---- fold Conv2d(1x1, bias=False) + BatchNorm affine through the interp ----
    # Small conv output z (N, Cout, H, W); conv commutes with the spatial interp.
    z = jnp.einsum('oc,nchw->nohw', conv_w, x)

    # BN train-mode batch stats of y = conv(interp(x)) = interp(z), computed from
    # the SMALL z via separable identities; mean removed before the second moment
    # so there is no E[y^2]-E[y]^2 cancellation.
    r_h = jnp.sum(A_h_j, axis=0)                     # (H,)
    r_w = jnp.sum(A_w_j, axis=0)                     # (W,)
    M = float(N * H2 * W2)
    mean_y = jnp.einsum('h,nohw,w->o', r_h, z, r_w) / M              # (Cout,)
    zc = z - mean_y[None, :, None, None]
    G_h = A_h_j.T @ A_h_j                            # (H, H)
    G_w = A_w_j.T @ A_w_j                            # (W, W)
    t = jnp.einsum('ah,nohw,wb->noab', G_h, zc, G_w)
    var_y = jnp.maximum(jnp.einsum('noab,noab->o', t, zc) / M, 0.0)  # biased var
    inv = jax.lax.rsqrt(var_y + eps)
    # Pre-scaled conv branch: interp(zb) == BN(conv(interp(x)))  (rows of A sum to 1)
    zb = zc * (gamma * inv)[None, :, None, None] + beta[None, :, None, None]
    # TODO(synk): BatchNorm running_mean / running_var buffer updates are not modeled.

    # ---------------- fused Pallas kernel: upsample x and zb (+ ReLU) ----------
    cap = _vmem_capacity_bytes()
    NB, est = _pick_nb(N, Cin, Cout, H, W, H2, W2, budget_bytes=int(0.3 * cap))
    vmem_limit = int(min(int(0.9 * cap), max(32 << 20, 2 * est)))
    Bi, Bo = NB * Cin, NB * Cout

    ahd_x = jnp.asarray(np.kron(np.eye(Bi, dtype=np.float32), A_h))  # (Bi*H2, Bi*H)
    ahd_z = jnp.asarray(np.kron(np.eye(Bo, dtype=np.float32), A_h))  # (Bo*H2, Bo*H)
    a_wt = jnp.asarray(A_w.T)                                        # (W, W2)

    x3 = x.reshape(N * Cin, H, W)        # free: minor two dims unchanged
    z3 = zb.reshape(N * Cout, H, W)

    xup2d, cv2d = pl.pallas_call(
        _fused_upsample_kernel,
        out_shape=(jax.ShapeDtypeStruct((N * Cin * H2, W2), jnp.float32),
                   jax.ShapeDtypeStruct((N * Cout * H2, W2), jnp.float32)),
        grid=(N // NB,),
        in_specs=[
            pl.BlockSpec((Bi * H2, Bi * H), lambda i: (0, 0)),
            pl.BlockSpec((Bo * H2, Bo * H), lambda i: (0, 0)),
            pl.BlockSpec((W, W2), lambda i: (0, 0)),
            pl.BlockSpec((Bi, H, W), lambda i: (i, 0, 0)),
            pl.BlockSpec((Bo, H, W), lambda i: (i, 0, 0)),
        ],
        out_specs=[
            pl.BlockSpec((Bi * H2, W2), lambda i: (i, 0)),
            pl.BlockSpec((Bo * H2, W2), lambda i: (i, 0)),
        ],
        compiler_params=pltpu.CompilerParams(
            dimension_semantics=("parallel",),
            vmem_limit_bytes=vmem_limit),
    )(ahd_x, ahd_z, a_wt, x3, z3)

    # Both reshapes keep the minor dim (W2) and split on 8-aligned row groups, so
    # no relayout of the large tensors is introduced here.
    x_up = xup2d.reshape(N, Cin, H2, W2)
    conv_out = cv2d.reshape(N, Cout, H2, W2)
    return x_up, conv_out


if __name__ == "__main__":
    key = jax.random.PRNGKey(0)
    k1, k2 = jax.random.split(key)

    N, Cin, H, W = 2, 4, 16, 16
    Cout = 8
    H2, W2 = 2 * H, 2 * W

    x = jax.random.normal(k1, (N, Cin, H, W), jnp.float32)

    # Conv2d(dim_in, dim_out, kernel_size=1, bias=False): weight (Cout, Cin, 1, 1)
    bound = 1.0 / (Cin * 1 * 1) ** 0.5
    conv_w4 = jax.random.uniform(k2, (Cout, Cin, 1, 1), jnp.float32, -bound, bound)
    conv_w = conv_w4.reshape(Cout, Cin)

    # BatchNorm2d default init (gamma=1, beta=0); forward uses train-mode batch stats.
    gamma = jnp.ones((Cout,), jnp.float32)
    beta = jnp.zeros((Cout,), jnp.float32)

    fwd = jax.jit(upsample_interpolate)
    x_up, conv_out = fwd(x, conv_w, gamma, beta)
    jax.block_until_ready((x_up, conv_out))

    # ---- pure-JAX reference for correctness ----
    A_h = jnp.asarray(_interp_matrix(H, H2))
    A_w = jnp.asarray(_interp_matrix(W, W2))
    ref_up = jnp.einsum('Hh,nchw,Ww->ncHW', A_h, x, A_w)
    y = jnp.einsum('oc,nchw->nohw', conv_w, ref_up)
    mu = jnp.mean(y, axis=(0, 2, 3), keepdims=True)
    var = jnp.mean((y - mu) ** 2, axis=(0, 2, 3), keepdims=True)
    ref_out = jnp.maximum(
        (y - mu) * jax.lax.rsqrt(var + 1e-5) * gamma.reshape(1, -1, 1, 1)
        + beta.reshape(1, -1, 1, 1), 0.0)

    assert x_up.shape == (N, Cin, H2, W2)
    assert conv_out.shape == (N, Cout, H2, W2)
    assert bool(jnp.all(jnp.isfinite(x_up))) and bool(jnp.all(jnp.isfinite(conv_out)))
    assert bool(jnp.all(conv_out >= 0.0))                      # ReLU applied
    assert float(jnp.max(jnp.abs(x_up - ref_up))) < 2e-3
    assert float(jnp.max(jnp.abs(conv_out - ref_out))) < 2e-3

    print("KERNEL_OK")
</pallas_src>

<mosaic_0001>
module attributes {stable_mosaic.version = 11 : i64} {
  func.func @_fused_upsample_kernel(%arg0: i32, %arg1: memref<128x64xf32, #tpu.memory_space<vmem>>, %arg2: memref<256x128xf32, #tpu.memory_space<vmem>>, %arg3: memref<16x32xf32, #tpu.memory_space<vmem>>, %arg4: memref<4x16x16xf32, #tpu.memory_space<vmem>>, %arg5: memref<8x16x16xf32, #tpu.memory_space<vmem>>, %arg6: memref<128x32xf32, #tpu.memory_space<vmem>>, %arg7: memref<256x32xf32, #tpu.memory_space<vmem>>) attributes {dimension_semantics = [#tpu.dimension_semantics<parallel>], iteration_bounds = array<i64: 2>, scalar_prefetch = 0 : i64, scratch_operands = 0 : i64, tpu.core_type = #tpu.core_type<tc>, window_params = [{pipeline_mode = #tpu.pipeline_mode<synchronous>, transform_indices = @transform_0, window_bounds = array<i64: 128, 64>}, {pipeline_mode = #tpu.pipeline_mode<synchronous>, transform_indices = @transform_1, window_bounds = array<i64: 256, 128>}, {pipeline_mode = #tpu.pipeline_mode<synchronous>, transform_indices = @transform_2, window_bounds = array<i64: 16, 32>}, {transform_indices = @transform_3, window_bounds = array<i64: 4, 16, 16>}, {transform_indices = @transform_4, window_bounds = array<i64: 8, 16, 16>}, {transform_indices = @transform_5, window_bounds = array<i64: 128, 32>}, {transform_indices = @transform_6, window_bounds = array<i64: 256, 32>}]} {
    %c0 = arith.constant 0 : index
    %c0_0 = arith.constant 0 : index
    %0 = vector.load %arg1[%c0, %c0_0] : memref<128x64xf32, #tpu.memory_space<vmem>>, vector<128x64xf32>
    %c0_1 = arith.constant 0 : index
    %c0_2 = arith.constant 0 : index
    %c0_3 = arith.constant 0 : index
    %1 = vector.load %arg4[%c0_1, %c0_2, %c0_3] : memref<4x16x16xf32, #tpu.memory_space<vmem>>, vector<4x16x16xf32>
    %2 = vector.shape_cast %1 : vector<4x16x16xf32> to vector<64x16xf32>
    %cst = arith.constant dense<0.000000e+00> : vector<128x16xf32>
    %3 = tpu.matmul %0, %2, %cst {dimension_numbers = #tpu.dot_dimension_numbers<[1], [0], [0], [1], [0, 0, 1, 1], [], []>} : vector<128x64xf32>, vector<64x16xf32>, vector<128x16xf32> -> vector<128x16xf32>
    %c0_4 = arith.constant 0 : index
    %c0_5 = arith.constant 0 : index
    %4 = vector.load %arg3[%c0_4, %c0_5] : memref<16x32xf32, #tpu.memory_space<vmem>>, vector<16x32xf32>
    %cst_6 = arith.constant dense<0.000000e+00> : vector<128x32xf32>
    %5 = tpu.matmul %3, %4, %cst_6 {dimension_numbers = #tpu.dot_dimension_numbers<[1], [0], [0], [1], [0, 0, 1, 1], [], []>} : vector<128x16xf32>, vector<16x32xf32>, vector<128x32xf32> -> vector<128x32xf32>
    %c0_7 = arith.constant 0 : index
    %c0_8 = arith.constant 0 : index
    %6 = vector.load %arg6[%c0_7, %c0_8] : memref<128x32xf32, #tpu.memory_space<vmem>>, vector<128x32xf32>
    tpu.vector_store %arg6[%c0_7, %c0_8], %5 {strides = array<i32>} : memref<128x32xf32, #tpu.memory_space<vmem>>, vector<128x32xf32>,
    %c0_9 = arith.constant 0 : index
    %c0_10 = arith.constant 0 : index
    %7 = vector.load %arg2[%c0_9, %c0_10] : memref<256x128xf32, #tpu.memory_space<vmem>>, vector<256x128xf32>
    %c0_11 = arith.constant 0 : index
    %c0_12 = arith.constant 0 : index
    %c0_13 = arith.constant 0 : index
    %8 = vector.load %arg5[%c0_11, %c0_12, %c0_13] : memref<8x16x16xf32, #tpu.memory_space<vmem>>, vector<8x16x16xf32>
    %9 = vector.shape_cast %8 : vector<8x16x16xf32> to vector<128x16xf32>
    %cst_14 = arith.constant dense<0.000000e+00> : vector<256x16xf32>
    %10 = tpu.matmul %7, %9, %cst_14 {dimension_numbers = #tpu.dot_dimension_numbers<[1], [0], [0], [1], [0, 0, 1, 1], [], []>} : vector<256x128xf32>, vector<128x16xf32>, vector<256x16xf32> -> vector<256x16xf32>
    %c0_15 = arith.constant 0 : index
    %c0_16 = arith.constant 0 : index
    %11 = vector.load %arg3[%c0_15, %c0_16] : memref<16x32xf32, #tpu.memory_space<vmem>>, vector<16x32xf32>
    %cst_17 = arith.constant dense<0.000000e+00> : vector<256x32xf32>
    %12 = tpu.matmul %10, %11, %cst_17 {dimension_numbers = #tpu.dot_dimension_numbers<[1], [0], [0], [1], [0, 0, 1, 1], [], []>} : vector<256x16xf32>, vector<16x32xf32>, vector<256x32xf32> -> vector<256x32xf32>
    %cst_18 = arith.constant 0.000000e+00 : f32
    %13 = vector.broadcast %cst_18 : f32 to vector<256x32xf32>
    %14 = arith.maximumf %12, %13 : vector<256x32xf32>
    %c0_19 = arith.constant 0 : index
    %c0_20 = arith.constant 0 : index
    %15 = vector.load %arg7[%c0_19, %c0_20] : memref<256x32xf32, #tpu.memory_space<vmem>>, vector<256x32xf32>
    tpu.vector_store %arg7[%c0_19, %c0_20], %14 {strides = array<i32>} : memref<256x32xf32, #tpu.memory_space<vmem>>, vector<256x32xf32>,
    return
  }
  func.func @transform_0(%arg0: i32) -> (i32, i32) {
    %c0_i32 = arith.constant 0 : i32
    %c0_i32_0 = arith.constant 0 : i32
    %c0_i32_1 = arith.constant 0 : i32
    return %c0_i32, %c0_i32_0 : i32, i32
  }
  func.func @transform_1(%arg0: i32) -> (i32, i32) {
    %c0_i32 = arith.constant 0 : i32
    %c0_i32_0 = arith.constant 0 : i32
    %c0_i32_1 = arith.constant 0 : i32
    return %c0_i32, %c0_i32_0 : i32, i32
  }
  func.func @transform_2(%arg0: i32) -> (i32, i32) {
    %c0_i32 = arith.constant 0 : i32
    %c0_i32_0 = arith.constant 0 : i32
    %c0_i32_1 = arith.constant 0 : i32
    return %c0_i32, %c0_i32_0 : i32, i32
  }
  func.func @transform_3(%arg0: i32) -> (i32, i32, i32) {
    %c0_i32 = arith.constant 0 : i32
    %c0_i32_0 = arith.constant 0 : i32
    %c0_i32_1 = arith.constant 0 : i32
    return %arg0, %c0_i32, %c0_i32_0 : i32, i32, i32
  }
  func.func @transform_4(%arg0: i32) -> (i32, i32, i32) {
    %c0_i32 = arith.constant 0 : i32
    %c0_i32_0 = arith.constant 0 : i32
    %c0_i32_1 = arith.constant 0 : i32
    return %arg0, %c0_i32, %c0_i32_0 : i32, i32, i32
  }
  func.func @transform_5(%arg0: i32) -> (i32, i32) {
    %c0_i32 = arith.constant 0 : i32
    %c0_i32_0 = arith.constant 0 : i32
    return %arg0, %c0_i32 : i32, i32
  }
  func.func @transform_6(%arg0: i32) -> (i32, i32) {
    %c0_i32 = arith.constant 0 : i32
    %c0_i32_0 = arith.constant 0 : i32
    return %arg0, %c0_i32 : i32, i32
  }
}

</mosaic_0001>

<bundles_post_ra>
// kernel: upsample_interpolate.1
= control target key start
LH: loop header
LB: loop body
LE: loop exit
PB: predicated region body
PF: predicated region fallthrough
CT: control target
= control target key end

     0   :  { %12 = vsyncpa [#allocation3], 0  ;;  %s2666_s0 = inlined_call_operand.vmem [shape: f32[128,64], index: 0, kind: input, shape index: {}]   ;;  %s2667_s1 = inlined_call_operand.vmem [shape: f32[256,128], index: 1, kind: input, shape index: {}]   ;;  %s2668_s2 = inlined_call_operand.vmem [shape: f32[16,32], index: 2, kind: input, shape index: {}]   ;;  %s2669_s3 = inlined_call_operand.vmem [shape: f32[8,16,16], index: 3, kind: input, shape index: {}]   ;;  %s2670_s4 = inlined_call_operand.vmem [shape: f32[16,16,16], index: 4, kind: input, shape index: {}]   ;;  %s2671_s5 = inlined_call_operand.hbm [shape: f32[256,32], index: 5, kind: output, shape index: {0}]   ;;  %s2672_s6 = inlined_call_operand.hbm [shape: f32[512,32], index: 6, kind: output, shape index: {1}]  }
   0x1   :  { %14 = vsyncpa [#allocation3 + $0x1], 0 }
   0x2   :  { %15 = vsyncpa [#allocation5], 0 }
   0x3   :  { %17 = vsyncpa [#allocation5 + $0x1], 0  ;;  %s2176_s21 = smov 0   ;;  %s2178_s22 = smov 0  }
   0x4   :  { %s2180_s23 = smov 0   ;;  %s2182_s24 = smov 0  }
   0x5 LB: > { %s2197_s25 = sadd.s32 4294967295, %s2135_s24   ;;  %s1525_s26 = sadd.s32 4294967294, %s2135_s24   ;;  %s2135_s24 = sphi %s2182_s24, %s2678_s24   ;;  %s2131_s23 = sphi %s2180_s23, %s2677_s23   ;;  %s2127_s22 = sphi %s2178_s22, %s2676_s22   ;;  %s2123_s21 = sphi %s2176_s21, %s2675_s21  }
   0x6   : > { %s2201_s27 = sadd.s32 1, %s2135_s24   ;;  %s145_s28 = sadd.s32 1, %s2131_s23 }
   0x7   : > { %s142_s29 = ssub.s32 %s2135_s24, %s2201_s27  ;;  %p155_p0 = scmp.ne.s32.totalorder %s2131_s23, %s2127_s22 }
   0x8   : > { %p143_p1 = scmp.eq.s32.totalorder %s142_s29, 0  ;;  %p156_p2 = scmp.eq.s32.totalorder %s2197_s25, 1 }
   0x9   : > { %p161_p3 = scmp.ne.s32.totalorder %s2127_s22, %s2123_s21  ;;  %p162_p4 = scmp.eq.s32.totalorder %s1525_s26, 1 }
   0xa   : > { %s2212_s30 = scalar_select %p143_p1, %s2131_s23, %s145_s28  }
   0xb   : > { %p2214_p5 = por %p156_p2, %p155_p0  ;;  %p2218_p6 = por %p162_p4, %p161_p3 }
   0xc   : > { %p1528_p7 = scmp.ge.s32.totalorder %s2135_s24, 1  ;;  %p235_p8 = scmp.lt.s32.totalorder %s2135_s24, 3 }
   0xe   : > { %p236_p9 = pnand %p1528_p7, %p235_p8 }
   0xf   : > { %s1531_s9 = sshll.u32 (!%p236_p9), %s2197_s25, 2  ;;  %v293_v0 = vld [vmem:[%s2666_s0] sm:$0xff] (!%p236_p9)  ;;  %vm317_vm0 = vcmask (!%p236_p9), 523264   ;;  %v512_v2 = vld [vmem:[%s2668_s2 + $0x8] sm:$0xff] (!%p236_p9)  ;;  %v295_v17 = vld [vmem:[%s2666_s0 + $0x10] sm:$0xff] (!%p236_p9)  ;;  %s1534_s20 = sshll.u32 (!%p236_p9), %s2197_s25, 3 }
  0x10   : > { %239 = sbr.rel (%p236_p9) target bundleno = 794 (0x31a), region = 40  ;;  %p278_p10 = scmp.lt.s32.totalorder (!%p236_p9), %s1531_s9, 7  ;;  %1753 = vmatprep.mubr.msk.f32.mxu0 (!%p236_p9), %vm317_vm0, %v293_v0  ;;  %v511_v1 = vld [vmem:[%s2668_s2] sm:$0xff] (!%p236_p9)  ;;  %v294_v16 = vld [vmem:[%s2666_s0 + $0x8] sm:$0xff] (!%p236_p9)  ;;  %v296_v18 = vld [vmem:[%s2666_s0 + $0x18] sm:$0xff] (!%p236_p9)  ;;  %vm513_vm1 = vcmask (!%p236_p9), 130048  }
  0x11   : > { %v2238_v3 = vpack.c.bf16 (!%p236_p9), %v512_v2, %v511_v1  ;;  %v297_v19 = vld [vmem:[%s2666_s0 + $0x20] sm:$0xff] (!%p236_p9)  ;;  %v298_v20 = vld [vmem:[%s2666_s0 + $0x28] sm:$0xff] (!%p236_p9)  ;;  %v299_v21 = vld [vmem:[%s2666_s0 + $0x30] sm:$0xff] (!%p236_p9)  ;;  %p285_p11 = scmp.lt.s32.totalorder (!%p236_p9), %s1534_s20, 15  ;;  %s2441_s14 = sand.u32 (!%p236_p9), 1, %s2127_s22   ;;  %vm707_vm2 = vcmask (!%p236_p9), 261120  }
  0x12   : > { %v300_v22 = vld [vmem:[%s2666_s0 + $0x38] sm:$0xff] (!%p236_p9)  ;;  %v301_v23 = vld [vmem:[%s2666_s0 + $0x40] sm:$0xff] (!%p236_p9)  ;;  %v302_v24 = vld [vmem:[%s2666_s0 + $0x48] sm:$0xff] (!%p236_p9)  ;;  %s1529_s15 = sshll.u32 (!%p236_p9), %s2441_s14, 7  ;;  %s1611_s17 = sshll.u32 (!%p236_p9), %s2197_s25, 11 }
  0x13   : > { %1954 = vmatprep.subr.bf16.mxu1 (!%p236_p9), %v2238_v3  ;;  %v303_v25 = vld [vmem:[%s2666_s0 + $0x50] sm:$0xff] (!%p236_p9)  ;;  %v304_v26 = vld [vmem:[%s2666_s0 + $0x58] sm:$0xff] (!%p236_p9)  ;;  %v305_v27 = vld [vmem:[%s2666_s0 + $0x60] sm:$0xff] (!%p236_p9)  ;;  %s2444_s16 = scalar_lea.vmem (!%p236_p9), [#allocation2], %s1529_s15  ;;  %s1385_s28 = scalar_lea.sflag (!%p236_p9), [#allocation3], %s2441_s14 }
  0x14   : > { %1956 = vmatpush3.bf16.msra.mxu1 (!%p236_p9), %v2238_v3  ;;  %v306_v28 = vld [vmem:[%s2666_s0 + $0x68] sm:$0xff] (!%p236_p9)  ;;  %v307_v29 = vld [vmem:[%s2666_s0 + $0x70] sm:$0xff] (!%p236_p9)  ;;  %v308_v30 = vld [vmem:[%s2666_s0 + $0x78] sm:$0xff] (!%p236_p9)  ;;  %s1403_s18 = sshll.u32 (!%p236_p9), %s2444_s16, 4  ;;  %s2517_s18 = int_to_ptr.vmem [resolvable:$true] %s1403_s18 }
  0x15   : > { %s2041_s29 = scalar_lea.vmem (!%p236_p9), %s2517_s18, 2048 }
  0x16   : > { %p2042_p12 = scmp.ne.s32.totalorder (!%p236_p9), %s2517_s18, %s2041_s29 }
  0x17   : > { %s2680_s9 = smov (!%p278_p10, %s1531_s9), 7  ;;  %s2682_s20 = smov (!%p285_p11, %s1534_s20), 15 }
  0x18   : > { %s1609_s12 = sshll.u32 %s2680_s9, 4  ;;  %s1610_s26 = sshll.u32 %s2682_s20, 4 }
  0x19   : > { %s282_s19 = scalar_lea.vmem %s2669_s3, %s1609_s12  ;;  %s2308_s9 = scalar_lea.vmem %s2670_s4, %s1610_s26 }
  0x1a   : > { %v309_v4 = vld [vmem:[%s282_s19] sm:$0xff]  ;;  %v310_v5 = vld [vmem:[%s282_s19 + $0x8] sm:$0xff]  ;;  %v311_v6 = vld [vmem:[%s282_s19 + $0x10] sm:$0xff]  ;;  %s2515_s26 = scalar_lea.hbm %s2671_s5, %s1611_s17  ;;  %p2043_p13 = pnand %p2042_p12, %p2214_p5 }
  0x1b   : > { %v1937_v7 = vpack.c.bf16 %v310_v5, %v309_v4  ;;  %v312_v8 = vld [vmem:[%s282_s19 + $0x18] sm:$0xff]  ;;  %v313_v10 = vld [vmem:[%s282_s19 + $0x20] sm:$0xff]  ;;  %v314_v11 = vld [vmem:[%s282_s19 + $0x28] sm:$0xff] }
  0x1c   : > { %v1941_v9 = vpack.c.bf16 %v312_v8, %v311_v6  ;;  %v1945_v12 = vpack.c.bf16 %v314_v11, %v313_v10  ;;  %v315_v13 = vld [vmem:[%s282_s19 + $0x30] sm:$0xff]  ;;  %v316_v14 = vld [vmem:[%s282_s19 + $0x38] sm:$0xff]  ;;  %v756_v31 = vld [vmem:[%s2308_s9] sm:$0xff]  ;;  %p2044_p0 = pneg %p2043_p13 }
  0x1d   : > { %1938 = vmatprep.subr.bf16.mxu0 %v1937_v7  ;;  %v1949_v15 = vpack.c.bf16 %v316_v14, %v315_v13  ;;  %v757_v32 = vld [vmem:[%s2308_s9 + $0x8] sm:$0xff]  ;;  %v758_v34 = vld [vmem:[%s2308_s9 + $0x10] sm:$0xff]  ;;  %v759_v35 = vld [vmem:[%s2308_s9 + $0x18] sm:$0xff] }
  0x1e   : > { %1940 = vmatpush3.bf16.msra.mxu0 %v1937_v7  ;;  %v1957_v33 = vpack.c.bf16 %v757_v32, %v756_v31  ;;  %v1961_v38 = vpack.c.bf16 %v759_v35, %v758_v34  ;;  %v760_v39 = vld [vmem:[%s2308_s9 + $0x20] sm:$0xff]  ;;  %v761_v40 = vld [vmem:[%s2308_s9 + $0x28] sm:$0xff]  ;;  %v762_v44 = vld [vmem:[%s2308_s9 + $0x30] sm:$0xff] }
  0x1f   : > { %1942 = vmatprep.subr.bf16.mxu0 %v1941_v9  ;;  %v1965_v43 = vpack.c.bf16 %v761_v40, %v760_v39  ;;  %v763_v45 = vld [vmem:[%s2308_s9 + $0x38] sm:$0xff]  ;;  %v764_v49 = vld [vmem:[%s2308_s9 + $0x40] sm:$0xff]  ;;  %v765_v50 = vld [vmem:[%s2308_s9 + $0x48] sm:$0xff] }
  0x20   : > { %1958 = vmatprep.subr.bf16.mxu1 %v1957_v33  ;;  %v1969_v48 = vpack.c.bf16 %v763_v45, %v762_v44  ;;  %v1973_v53 = vpack.c.bf16 %v765_v50, %v764_v49  ;;  %v766_v54 = vld [vmem:[%s2308_s9 + $0x50] sm:$0xff]  ;;  %v767_v55 = vld [vmem:[%s2308_s9 + $0x58] sm:$0xff]  ;;  %v768_v59 = vld [vmem:[%s2308_s9 + $0x60] sm:$0xff] }
  0x21   : > { %v1977_v58 = vpack.c.bf16 %v767_v55, %v766_v54  ;;  %v769_v60 = vld [vmem:[%s2308_s9 + $0x68] sm:$0xff]  ;;  %v770_v0 = vld [vmem:[%s2308_s9 + $0x70] sm:$0xff]  ;;  %v771_v1 = vld [vmem:[%s2308_s9 + $0x78] sm:$0xff]  ;;  %s2137_s9 = smov [#allocation2]  }
  0x22   : > { %1944 = vmatpush3.bf16.msra.mxu0 %v1941_v9  ;;  %v1981_v63 = vpack.c.bf16 %v769_v60, %v768_v59  ;;  %v1985_v5 = vpack.c.bf16 %v771_v1, %v770_v0  ;;  %v724_v8 = vld [vmem:[%s2667_s1] sm:$0xff]  ;;  %v725_v9 = vld [vmem:[%s2667_s1 + $0x8] sm:$0xff]  ;;  %v726_v10 = vld [vmem:[%s2667_s1 + $0x10] sm:$0xff]  ;;  %s2045_s10 = sshll.u32 %s2137_s9, 4  ;;  %s2046_s10 = int_to_ptr.vmem [resolvable:$false] %s2045_s10 }
  0x23   : > { %1946 = vmatprep.subr.bf16.mxu0 %v1945_v12  ;;  %v727_v11 = vld [vmem:[%s2667_s1 + $0x18] sm:$0xff]  ;;  %v729_v13 = vld [vmem:[%s2667_s1 + $0x28] sm:$0xff]  ;;  %v730_v14 = vld [vmem:[%s2667_s1 + $0x30] sm:$0xff]  ;;  %s2047_s11 = scalar_lea.vmem %s2046_s10, 4096  ;;  %p2048_p1 = scmp.lt.s32.totalorder %s2517_s18, %s2046_s10 }
  0x24   : > { %v748_v31 = vld [vmem:[%s2667_s1 + $0xc0] sm:$0xff]  ;;  %v749_v32 = vld [vmem:[%s2667_s1 + $0xc8] sm:$0xff]  ;;  %v751_v34 = vld [vmem:[%s2667_s1 + $0xd8] sm:$0xff]  ;;  %p2049_p2 = scmp.lt.s32.totalorder %s2047_s11, %s2041_s29 }
  0x25   : > { %v752_v35 = vld [vmem:[%s2667_s1 + $0xe0] sm:$0xff] }
  0x26   : > { %1948 = vmatpush3.bf16.msra.mxu0 %v1945_v12  ;;  %v728_v12 = vld [vmem:[%s2667_s1 + $0x20] sm:$0xff]  ;;  %p2050_p3 = por %p2049_p2, %p2048_p1 }
  0x27   : > { %1950 = vmatprep.subr.bf16.mxu0 %v1949_v15 }
  0x28   : > { %p2051_p4 = pnand %p2050_p3, %p2044_p0 }
  0x2a   : > { %1952 = vmatpush3.bf16.msra.mxu0 %v1949_v15  ;;  %v732_v15 = vld [vmem:[%s2667_s1 + $0x40] sm:$0xff] }
  0x2b   : > { %1990 = vmatprep.subr.bf16.mxu0 %v2238_v3 }
  0x2d   : > { %1754 = vmatmul.mubr.msk.f32.vlgmr.msra.gmra.mrb[0].mxu0 %vm317_vm0, %v294_v16  ;;  %v733_v16 = vld [vmem:[%s2667_s1 + $0x48] sm:$0xff] }
  0x2e   : > { %1756 = vmatprep.mubr.msk.f32.mxu0 %vm317_vm0, %v295_v17  ;;  %1992 = vmatpush3.bf16.msra.mxu0 %v2238_v3  ;;  %v734_v17 = vld [vmem:[%s2667_s1 + $0x50] sm:$0xff] }
  0x31   : > { %1757 = vmatmul.mubr.msk.f32.gmra.mrb[2].mxu0 %vm317_vm0, %v296_v18  ;;  %v735_v18 = vld [vmem:[%s2667_s1 + $0x58] sm:$0xff] }
  0x32   : > { %1759 = vmatprep.mubr.msk.f32.mxu0 %vm317_vm0, %v297_v19  ;;  %v736_v19 = vld [vmem:[%s2667_s1 + $0x60] sm:$0xff] }
  0x35   : > { %1760 = vmatmul.mubr.msk.f32.gmra.mrb[4].mxu0 %vm317_vm0, %v298_v20  ;;  %v737_v20 = vld [vmem:[%s2667_s1 + $0x68] sm:$0xff] }
  0x36   : > { %1762 = vmatprep.mubr.msk.f32.mxu0 %vm317_vm0, %v299_v21  ;;  %v738_v21 = vld [vmem:[%s2667_s1 + $0x70] sm:$0xff] }
  0x39   : > { %1763 = vmatmul.mubr.msk.f32.gmra.mrb[6].mxu0 %vm317_vm0, %v300_v22  ;;  %v739_v22 = vld [vmem:[%s2667_s1 + $0x78] sm:$0xff] }
  0x3a   : > { %1765 = vmatprep.mubr.msk.f32.mxu0 %vm317_vm0, %v301_v23  ;;  %v740_v23 = vld [vmem:[%s2667_s1 + $0x80] sm:$0xff] }
  0x3d   : > { %1766 = vmatmul.mubr.msk.f32.gmra.mrb[8].mxu0 %vm317_vm0, %v302_v24  ;;  %v741_v24 = vld [vmem:[%s2667_s1 + $0x88] sm:$0xff] }
  0x3e   : > { %1768 = vmatprep.mubr.msk.f32.mxu0 %vm317_vm0, %v303_v25  ;;  %v742_v25 = vld [vmem:[%s2667_s1 + $0x90] sm:$0xff] }
  0x41   : > { %1769 = vmatmul.mubr.msk.f32.gmra.mrb[10].mxu0 %vm317_vm0, %v304_v26  ;;  %v743_v26 = vld [vmem:[%s2667_s1 + $0x98] sm:$0xff] }
  0x42   : > { %1771 = vmatprep.mubr.msk.f32.mxu0 %vm317_vm0, %v305_v27  ;;  %v744_v27 = vld [vmem:[%s2667_s1 + $0xa0] sm:$0xff] }
  0x45   : > { %1772 = vmatmul.mubr.msk.f32.gmra.mrb[12].mxu0 %vm317_vm0, %v306_v28  ;;  %v745_v28 = vld [vmem:[%s2667_s1 + $0xa8] sm:$0xff] }
  0x46   : > { %1774 = vmatprep.mubr.msk.f32.mxu0 %vm317_vm0, %v307_v29  ;;  %v746_v29 = vld [vmem:[%s2667_s1 + $0xb0] sm:$0xff] }
  0x49   : > { %1775 = vmatmul.mubr.msk.f32.gmra.mrb[14].mxu0 %vm317_vm0, %v308_v30  ;;  %v747_v30 = vld [vmem:[%s2667_s1 + $0xb8] sm:$0xff] }
 0x100   : > { %v1755_v36 = vpop.f32.mrb[0].mxu0 }
 0x101   : > { %v432_v37 = vpop.f32.mrb[1].mxu0 }
 0x102   : > { %1781 = vmatprep.mubr.msk.f32.mxu1 %vm513_vm1, %v432_v37  ;;  %v754_v37 = vld [vmem:[%s2667_s1 + $0xf0] sm:$0xff] }
 0x103   : > { %1782 = vmatmul.mubr.msk.f32.vlgmr.msra.gmra.mrb[0].mxu1 %vm513_vm1, %v1755_v36  ;;  %v753_v36 = vld [vmem:[%s2667_s1 + $0xe8] sm:$0xff] }
 0x104   : > { %1960 = vmatpush3.bf16.msra.mxu1 %v1957_v33  ;;  %v1758_v41 = vpop.f32.mrb[2].mxu0  ;;  %v750_v33 = vld [vmem:[%s2667_s1 + $0xd0] sm:$0xff] }
 0x105   : > { %v442_v42 = vpop.f32.mrb[3].mxu0  ;;  %1962 = vmatprep.subr.bf16.mxu1 %v1961_v38 }
 0x106   : > { %1784 = vmatprep.mubr.msk.f32.mxu1 %vm513_vm1, %v442_v42 }
 0x107   : > { %1785 = vmatmul.mubr.msk.f32.gmra.mrb[2].mxu1 %vm513_vm1, %v1758_v41 }
 0x108   : > { %1964 = vmatpush3.bf16.msra.mxu1 %v1961_v38  ;;  %v1761_v46 = vpop.f32.mrb[4].mxu0  ;;  %v755_v38 = vld [vmem:[%s2667_s1 + $0xf8] sm:$0xff] }
 0x109   : > { %v452_v47 = vpop.f32.mrb[5].mxu0  ;;  %1966 = vmatprep.subr.bf16.mxu1 %v1965_v43 }
 0x10a   : > { %1787 = vmatprep.mubr.msk.f32.mxu1 %vm513_vm1, %v452_v47 }
 0x10b   : > { %1788 = vmatmul.mubr.msk.f32.gmra.mrb[4].mxu1 %vm513_vm1, %v1761_v46 }
 0x10c   : > { %1968 = vmatpush3.bf16.msra.mxu1 %v1965_v43  ;;  %v1764_v51 = vpop.f32.mrb[6].mxu0 }
 0x10d   : > { %v462_v52 = vpop.f32.mrb[7].mxu0  ;;  %1970 = vmatprep.subr.bf16.mxu1 %v1969_v48 }
 0x10e   : > { %1790 = vmatprep.mubr.msk.f32.mxu1 %vm513_vm1, %v462_v52 }
 0x10f   : > { %1791 = vmatmul.mubr.msk.f32.gmra.mrb[6].mxu1 %vm513_vm1, %v1764_v51 }
 0x110   : > { %1972 = vmatpush3.bf16.msra.mxu1 %v1969_v48  ;;  %v1767_v56 = vpop.f32.mrb[8].mxu0 }
 0x111   : > { %v472_v57 = vpop.f32.mrb[9].mxu0  ;;  %1974 = vmatprep.subr.bf16.mxu1 %v1973_v53 }
 0x112   : > { %1793 = vmatprep.mubr.msk.f32.mxu1 %vm513_vm1, %v472_v57 }
 0x113   : > { %1794 = vmatmul.mubr.msk.f32.gmra.mrb[8].mxu1 %vm513_vm1, %v1767_v56 }
 0x114   : > { %1976 = vmatpush3.bf16.msra.mxu1 %v1973_v53  ;;  %v1770_v61 = vpop.f32.mrb[10].mxu0 }
 0x115   : > { %v482_v62 = vpop.f32.mrb[11].mxu0  ;;  %1978 = vmatprep.subr.bf16.mxu1 %v1977_v58 }
 0x116   : > { %1796 = vmatprep.mubr.msk.f32.mxu1 %vm513_vm1, %v482_v62 }
 0x117   : > { %1797 = vmatmul.mubr.msk.f32.gmra.mrb[10].mxu1 %vm513_vm1, %v1770_v61 }
 0x118   : > { %1980 = vmatpush3.bf16.msra.mxu1 %v1977_v58  ;;  %v1773_v2 = vpop.f32.mrb[12].mxu0 }
 0x119   : > { %v492_v4 = vpop.f32.mrb[13].mxu0  ;;  %1982 = vmatprep.subr.bf16.mxu1 %v1981_v63 }
 0x11a   : > { %1799 = vmatprep.mubr.msk.f32.mxu1 %vm513_vm1, %v492_v4 }
 0x11b   : > { %1800 = vmatmul.mubr.msk.f32.gmra.mrb[12].mxu1 %vm513_vm1, %v1773_v2 }
 0x11c   : > { %1984 = vmatpush3.bf16.msra.mxu1 %v1981_v63  ;;  %v1776_v6 = vpop.f32.mrb[14].mxu0 }
 0x11d   : > { %v502_v7 = vpop.f32.mrb[15].mxu0  ;;  %1986 = vmatprep.subr.bf16.mxu1 %v1985_v5 }
 0x11e   : > { %1802 = vmatprep.mubr.msk.f32.mxu1 %vm513_vm1, %v502_v7 }
 0x11f   : > { %1803 = vmatmul.mubr.msk.f32.gmra.mrb[14].mxu1 %vm513_vm1, %v1776_v6 }
 0x120   : > { %1988 = vmatpush3.bf16.msra.mxu1 %v1985_v5  ;;  %1837 = vmatprep.mubr.f32.mxu1 %v724_v8 }
 0x121   : > { %1993 = vmatprep.subr.bf16.mxu1 %v2238_v3 }
 0x123   : > { %1838 = vmatmul.mubr.f32.vlgmr.msra.gmra.mrb[16].mxu1 %v725_v9 }
 0x124   : > { %1840 = vmatprep.mubr.f32.mxu1 %v726_v10  ;;  %1994 = vmatpush3.bf16.msra.mxu1 %v2238_v3  ;;  %v731_v3 = vld [vmem:[%s2667_s1 + $0x38] sm:$0xff] }
 0x127   : > { %1841 = vmatmul.mubr.f32.gmra.mrb[18].mxu1 %v727_v11 }
 0x128   : > { %1843 = vmatprep.mubr.f32.mxu1 %v728_v12 }
 0x12b   : > { %1844 = vmatmul.mubr.f32.gmra.mrb[20].mxu1 %v729_v13 }
 0x12c   : > { %1846 = vmatprep.mubr.f32.mxu1 %v730_v14 }
 0x12f   : > { %1847 = vmatmul.mubr.f32.gmra.mrb[22].mxu1 %v731_v3 }
 0x130   : > { %1849 = vmatprep.mubr.f32.mxu1 %v732_v15 }
 0x133   : > { %1850 = vmatmul.mubr.f32.gmra.mrb[24].mxu1 %v733_v16 }
 0x134   : > { %1852 = vmatprep.mubr.f32.mxu1 %v734_v17 }
 0x137   : > { %1853 = vmatmul.mubr.f32.gmra.mrb[26].mxu1 %v735_v18 }
 0x138   : > { %1855 = vmatprep.mubr.f32.mxu1 %v736_v19 }
 0x13b   : > { %1856 = vmatmul.mubr.f32.gmra.mrb[28].mxu1 %v737_v20 }
 0x13c   : > { %1858 = vmatprep.mubr.f32.mxu1 %v738_v21 }
 0x13f   : > { %1859 = vmatmul.mubr.f32.gmra.mrb[30].mxu1 %v739_v22 }
 0x140   : > { %1861 = vmatprep.mubr.f32.mxu1 %v740_v23 }
 0x143   : > { %1862 = vmatmul.mubr.f32.gmra.mrb[32].mxu1 %v741_v24 }
 0x144   : > { %1864 = vmatprep.mubr.f32.mxu1 %v742_v25 }
 0x147   : > { %1865 = vmatmul.mubr.f32.gmra.mrb[34].mxu1 %v743_v26 }
 0x148   : > { %1867 = vmatprep.mubr.f32.mxu1 %v744_v27 }
 0x14b   : > { %1868 = vmatmul.mubr.f32.gmra.mrb[36].mxu1 %v745_v28 }
 0x14c   : > { %1870 = vmatprep.mubr.f32.mxu1 %v746_v29 }
 0x14f   : > { %1871 = vmatmul.mubr.f32.gmra.mrb[38].mxu1 %v747_v30 }
 0x150   : > { %1873 = vmatprep.mubr.f32.mxu1 %v748_v31 }
 0x153   : > { %1874 = vmatmul.mubr.f32.gmra.mrb[40].mxu1 %v749_v32 }
 0x154   : > { %1876 = vmatprep.mubr.f32.mxu1 %v750_v33 }
 0x157   : > { %1877 = vmatmul.mubr.f32.gmra.mrb[42].mxu1 %v751_v34 }
 0x158   : > { %1879 = vmatprep.mubr.f32.mxu1 %v752_v35 }
 0x15b   : > { %1880 = vmatmul.mubr.f32.gmra.mrb[44].mxu1 %v753_v36 }
 0x15c   : > { %1882 = vmatprep.mubr.f32.mxu1 %v754_v37 }
 0x15f   : > { %1883 = vmatmul.mubr.f32.gmra.mrb[46].mxu1 %v755_v38 }
 0x1d6   : > { %v1783_v39 = vpop.f32.mrb[0].mxu1 }
 0x1d7   : > { %709 = vst.msk [vmem:[%s2444_s16 + $0x8] sm:$0xff] %vm707_vm2, %v1783_v39  ;;  %v628_v40 = vpop.f32.mrb[1].mxu1 }
 0x1d8   : > { %708 = vst.msk [vmem:[%s2444_s16] sm:$0xff] %vm707_vm2, %v628_v40 }
 0x1da   : > { %v1786_v41 = vpop.f32.mrb[2].mxu1 }
 0x1db   : > { %711 = vst.msk [vmem:[%s2444_s16 + $0x18] sm:$0xff] %vm707_vm2, %v1786_v41  ;;  %v638_v42 = vpop.f32.mrb[3].mxu1 }
 0x1dc   : > { %710 = vst.msk [vmem:[%s2444_s16 + $0x10] sm:$0xff] %vm707_vm2, %v638_v42 }
 0x1de   : > { %v1789_v43 = vpop.f32.mrb[4].mxu1 }
 0x1df   : > { %713 = vst.msk [vmem:[%s2444_s16 + $0x28] sm:$0xff] %vm707_vm2, %v1789_v43  ;;  %v648_v44 = vpop.f32.mrb[5].mxu1 }
 0x1e0   : > { %712 = vst.msk [vmem:[%s2444_s16 + $0x20] sm:$0xff] %vm707_vm2, %v648_v44 }
 0x1e2   : > { %v1792_v45 = vpop.f32.mrb[6].mxu1 }
 0x1e3   : > { %715 = vst.msk [vmem:[%s2444_s16 + $0x38] sm:$0xff] %vm707_vm2, %v1792_v45  ;;  %v658_v46 = vpop.f32.mrb[7].mxu1 }
 0x1e4   : > { %714 = vst.msk [vmem:[%s2444_s16 + $0x30] sm:$0xff] %vm707_vm2, %v658_v46 }
 0x1e6   : > { %v1795_v47 = vpop.f32.mrb[8].mxu1 }
 0x1e7   : > { %717 = vst.msk [vmem:[%s2444_s16 + $0x48] sm:$0xff] %vm707_vm2, %v1795_v47  ;;  %v668_v48 = vpop.f32.mrb[9].mxu1 }
 0x1e8   : > { %716 = vst.msk [vmem:[%s2444_s16 + $0x40] sm:$0xff] %vm707_vm2, %v668_v48 }
 0x1ea   : > { %v1798_v49 = vpop.f32.mrb[10].mxu1 }
 0x1eb   : > { %719 = vst.msk [vmem:[%s2444_s16 + $0x58] sm:$0xff] %vm707_vm2, %v1798_v49  ;;  %v678_v50 = vpop.f32.mrb[11].mxu1 }
 0x1ec   : > { %718 = vst.msk [vmem:[%s2444_s16 + $0x50] sm:$0xff] %vm707_vm2, %v678_v50 }
 0x1ee   : > { %v1801_v51 = vpop.f32.mrb[12].mxu1 }
 0x1ef   : > { %721 = vst.msk [vmem:[%s2444_s16 + $0x68] sm:$0xff] %vm707_vm2, %v1801_v51  ;;  %v688_v52 = vpop.f32.mrb[13].mxu1 }
 0x1f0   : > { %720 = vst.msk [vmem:[%s2444_s16 + $0x60] sm:$0xff] %vm707_vm2, %v688_v52 }
 0x1f2   : > { %v1804_v53 = vpop.f32.mrb[14].mxu1 }
 0x1f3   : > { %723 = vst.msk [vmem:[%s2444_s16 + $0x78] sm:$0xff] %vm707_vm2, %v1804_v53  ;;  %v698_v54 = vpop.f32.mrb[15].mxu1 }
 0x1f4   : > { %722 = vst.msk [vmem:[%s2444_s16 + $0x70] sm:$0xff] %vm707_vm2, %v698_v54 }
 0x1f6   : > { %v1839_v55 = vpop.f32.mrb[16].mxu1 }
 0x1f7   : > { %v838_v56 = vpop.f32.mrb[17].mxu1 }
 0x1f8   : > { %1889 = vmatprep.mubr.msk.f32.mxu0 %vm513_vm1, %v838_v56 }
 0x1f9   : > { %1890 = vmatmul.mubr.msk.f32.vlgmr.msra.gmra.mrb[16].mxu0 %vm513_vm1, %v1839_v55 }
 0x1fa   : > { %v1842_v57 = vpop.f32.mrb[18].mxu1 }
 0x1fb   : > { %v848_v58 = vpop.f32.mrb[19].mxu1 }
 0x1fc   : > { %1892 = vmatprep.mubr.msk.f32.mxu0 %vm513_vm1, %v848_v58 }
 0x1fd   : > { %1893 = vmatmul.mubr.msk.f32.gmra.mrb[18].mxu0 %vm513_vm1, %v1842_v57 }
 0x1fe   : > { %v1845_v59 = vpop.f32.mrb[20].mxu1 }
 0x1ff   : > { %v858_v60 = vpop.f32.mrb[21].mxu1 }
 0x200   : > { %1895 = vmatprep.mubr.msk.f32.mxu0 %vm513_vm1, %v858_v60 }
 0x201   : > { %1896 = vmatmul.mubr.msk.f32.gmra.mrb[20].mxu0 %vm513_vm1, %v1845_v59 }
 0x202   : > { %v1848_v61 = vpop.f32.mrb[22].mxu1 }
 0x203   : > { %v868_v62 = vpop.f32.mrb[23].mxu1 }
 0x204   : > { %1898 = vmatprep.mubr.msk.f32.mxu0 %vm513_vm1, %v868_v62 }
 0x205   : > { %1899 = vmatmul.mubr.msk.f32.gmra.mrb[22].mxu0 %vm513_vm1, %v1848_v61 }
 0x206   : > { %v1851_v63 = vpop.f32.mrb[24].mxu1 }
 0x207   : > { %v878_v0 = vpop.f32.mrb[25].mxu1 }
 0x208   : > { %1901 = vmatprep.mubr.msk.f32.mxu0 %vm513_vm1, %v878_v0 }
 0x209   : > { %1902 = vmatmul.mubr.msk.f32.gmra.mrb[24].mxu0 %vm513_vm1, %v1851_v63 }
 0x20a   : > { %v1854_v1 = vpop.f32.mrb[26].mxu1 }
 0x20b   : > { %v888_v2 = vpop.f32.mrb[27].mxu1 }
 0x20c   : > { %1904 = vmatprep.mubr.msk.f32.mxu0 %vm513_vm1, %v888_v2 }
 0x20d   : > { %1905 = vmatmul.mubr.msk.f32.gmra.mrb[26].mxu0 %vm513_vm1, %v1854_v1 }
 0x20e   : > { %v1857_v4 = vpop.f32.mrb[28].mxu1 }
 0x20f   : > { %v898_v5 = vpop.f32.mrb[29].mxu1 }
 0x210   : > { %1907 = vmatprep.mubr.msk.f32.mxu0 %vm513_vm1, %v898_v5 }
 0x211   : > { %1908 = vmatmul.mubr.msk.f32.gmra.mrb[28].mxu0 %vm513_vm1, %v1857_v4 }
 0x212   : > { %v1860_v6 = vpop.f32.mrb[30].mxu1 }
 0x213   : > { %v908_v7 = vpop.f32.mrb[31].mxu1 }
 0x214   : > { %1910 = vmatprep.mubr.msk.f32.mxu0 %vm513_vm1, %v908_v7 }
 0x215   : > { %1911 = vmatmul.mubr.msk.f32.gmra.mrb[30].mxu0 %vm513_vm1, %v1860_v6 }
 0x216   : > { %v1863_v8 = vpop.f32.mrb[32].mxu1 }
 0x217   : > { %v918_v9 = vpop.f32.mrb[33].mxu1 }
 0x218   : > { %1913 = vmatprep.mubr.msk.f32.mxu0 %vm513_vm1, %v918_v9 }
 0x219   : > { %1914 = vmatmul.mubr.msk.f32.gmra.mrb[32].mxu0 %vm513_vm1, %v1863_v8 }
 0x21a   : > { %v1866_v10 = vpop.f32.mrb[34].mxu1 }
 0x21b   : > { %v928_v11 = vpop.f32.mrb[35].mxu1 }
 0x21c   : > { %1916 = vmatprep.mubr.msk.f32.mxu0 %vm513_vm1, %v928_v11 }
 0x21d   : > { %1917 = vmatmul.mubr.msk.f32.gmra.mrb[34].mxu0 %vm513_vm1, %v1866_v10 }
 0x21e   : > { %v1869_v12 = vpop.f32.mrb[36].mxu1 }
 0x21f   : > { %v938_v13 = vpop.f32.mrb[37].mxu1 }
 0x220   : > { %1919 = vmatprep.mubr.msk.f32.mxu0 %vm513_vm1, %v938_v13 }
 0x221   : > { %1920 = vmatmul.mubr.msk.f32.gmra.mrb[36].mxu0 %vm513_vm1, %v1869_v12 }
 0x222   : > { %v1872_v14 = vpop.f32.mrb[38].mxu1 }
 0x223   : > { %v948_v3 = vpop.f32.mrb[39].mxu1 }
 0x224   : > { %1922 = vmatprep.mubr.msk.f32.mxu0 %vm513_vm1, %v948_v3 }
 0x225   : > { %1923 = vmatmul.mubr.msk.f32.gmra.mrb[38].mxu0 %vm513_vm1, %v1872_v14 }
 0x226   : > { %v1875_v15 = vpop.f32.mrb[40].mxu1 }
 0x227   : > { %v958_v16 = vpop.f32.mrb[41].mxu1 }
 0x228   : > { %1925 = vmatprep.mubr.msk.f32.mxu0 %vm513_vm1, %v958_v16 }
 0x229   : > { %1926 = vmatmul.mubr.msk.f32.gmra.mrb[40].mxu0 %vm513_vm1, %v1875_v15 }
 0x22a   : > { %v1878_v17 = vpop.f32.mrb[42].mxu1 }
 0x22b   : > { %v968_v18 = vpop.f32.mrb[43].mxu1 }
 0x22c   : > { %1928 = vmatprep.mubr.msk.f32.mxu0 %vm513_vm1, %v968_v18 }
 0x22d   : > { %1929 = vmatmul.mubr.msk.f32.gmra.mrb[42].mxu0 %vm513_vm1, %v1878_v17 }
 0x22e   : > { %v1881_v19 = vpop.f32.mrb[44].mxu1 }
 0x22f   : > { %v978_v20 = vpop.f32.mrb[45].mxu1 }
 0x230   : > { %1931 = vmatprep.mubr.msk.f32.mxu0 %vm513_vm1, %v978_v20 }
 0x231   : > { %1932 = vmatmul.mubr.msk.f32.gmra.mrb[44].mxu0 %vm513_vm1, %v1881_v19 }
 0x232   : > { %v1884_v21 = vpop.f32.mrb[46].mxu1 }
 0x233   : > { %v988_v22 = vpop.f32.mrb[47].mxu1 }
 0x234   : > { %1934 = vmatprep.mubr.msk.f32.mxu1 %vm513_vm1, %v988_v22 }
 0x235   : > { %1935 = vmatmul.mubr.msk.f32.vlgmr.msra.gmra.mrb[48].mxu1 %vm513_vm1, %v1884_v21 }
 0x236   : > { %2054 = shalt.err (!%p2051_p4)
}
 0x237   : > { %s2055_s12 = scalar_lea.hbm %s2515_s26, 2048  ;;  %s2059_s16 = scalar_lea.hbm %s2671_s5, 4096 }
 0x238   : > { %p2056_p7 = scmp.ne.s32.totalorder %s2515_s26, %s2055_s12  ;;  %p2060_p10 = scmp.lt.u32.totalorder %s2515_s26, %s2671_s5 }
 0x239   : > { %p2061_p11 = scmp.lt.u32.totalorder %s2059_s16, %s2055_s12  ;;  %p2063_p13 = scmp.lt.u32.totalorder %s2055_s12, %s2515_s26 }
 0x23a   : > { %p2057_p8 = pnand %p2056_p7, %p2214_p5 }
 0x23b   : > { %p2062_p12 = por %p2061_p11, %p2060_p10 }
 0x23c   : > { %p2058_p9 = pneg %p2057_p8 }
 0x23d   : > { %p2064_p0 = por %p2063_p13, %p2062_p12 }
 0x23f   : > { %p2065_p1 = pnand %p2064_p0, %p2058_p9 }
 0x241   : > { %2068 = shalt.err (!%p2065_p1)
}
 0x242   : > { %s2138_s20 = smov 128   ;;  %s2139_s29 = smov 8  }
 0x243   : > { %1995 = dma.vmem_to_hbm [thread:$0]  (%p2214_p5), %s2517_s18, 2048, %s2515_s26, %s1385_s28, %s2138_s20, %s2138_s20, %s2139_s29  }
 0x244   : > { %s1530_s9 = sshll.u32 %s2441_s14, 8  ;;  %s1612_s18 = sshll.u32 %s2197_s25, 12 }
 0x245   : > { %s2547_s10 = scalar_lea.vmem [#allocation4], %s1530_s9  ;;  %s2614_s12 = scalar_lea.hbm %s2672_s6, %s1612_s18 }
 0x246   : > { %s1419_s26 = sshll.u32 %s2547_s10, 4  ;;  %s1390_s25 = scalar_lea.sflag [#allocation5], %s2441_s14  ;;  %s2616_s26 = int_to_ptr.vmem [resolvable:$true] %s1419_s26 }
 0x247   : > { %s2069_s13 = scalar_lea.vmem %s2616_s26, 4096  ;;  %s2140_s15 = smov [#allocation4]  }
 0x248   : > { %p2070_p2 = scmp.ne.s32.totalorder %s2616_s26, %s2069_s13  ;;  %s2073_s16 = sshll.u32 %s2140_s15, 4  ;;  %s2074_s16 = int_to_ptr.vmem [resolvable:$false] %s2073_s16 }
 0x249   : > { %s2075_s17 = scalar_lea.vmem %s2074_s16, 8192  ;;  %p2076_p7 = scmp.lt.s32.totalorder %s2616_s26, %s2074_s16 }
 0x24a   : > { %p2071_p3 = pnand %p2070_p2, %p2214_p5  ;;  %p2077_p8 = scmp.lt.s32.totalorder %s2075_s17, %s2069_s13 }
 0x24c   : > { %p2072_p4 = pneg %p2071_p3  ;;  %p2078_p9 = por %p2077_p8, %p2076_p7 }
 0x24e   : > { %p2079_p10 = pnand %p2078_p9, %p2072_p4 }
 0x2cc   : > { %v1891_v23 = vpop.f32.mrb[16].mxu0 }
 0x2cd   : > { %v1321_v24 = vmax.f32 %v1891_v23, 0.0  ;;  %v1161_v25 = vpop.f32.mrb[17].mxu0 }
 0x2ce   : > { %v1320_v26 = vmax.f32 %v1161_v25, 0.0 }
 0x2cf   : > { %1353 = vst.msk [vmem:[%s2547_s10 + $0x8] sm:$0xff] %vm707_vm2, %v1321_v24 }
 0x2d0   : > { %1352 = vst.msk [vmem:[%s2547_s10] sm:$0xff] %vm707_vm2, %v1320_v26  ;;  %v1894_v27 = vpop.f32.mrb[18].mxu0 }
 0x2d1   : > { %v1323_v28 = vmax.f32 %v1894_v27, 0.0  ;;  %v1171_v29 = vpop.f32.mrb[19].mxu0 }
 0x2d2   : > { %v1322_v30 = vmax.f32 %v1171_v29, 0.0 }
 0x2d3   : > { %1355 = vst.msk [vmem:[%s2547_s10 + $0x18] sm:$0xff] %vm707_vm2, %v1323_v28 }
 0x2d4   : > { %1354 = vst.msk [vmem:[%s2547_s10 + $0x10] sm:$0xff] %vm707_vm2, %v1322_v30  ;;  %v1897_v31 = vpop.f32.mrb[20].mxu0 }
 0x2d5   : > { %v1325_v32 = vmax.f32 %v1897_v31, 0.0  ;;  %v1181_v33 = vpop.f32.mrb[21].mxu0 }
 0x2d6   : > { %v1324_v34 = vmax.f32 %v1181_v33, 0.0 }
 0x2d7   : > { %1357 = vst.msk [vmem:[%s2547_s10 + $0x28] sm:$0xff] %vm707_vm2, %v1325_v32 }
 0x2d8   : > { %1356 = vst.msk [vmem:[%s2547_s10 + $0x20] sm:$0xff] %vm707_vm2, %v1324_v34  ;;  %v1900_v35 = vpop.f32.mrb[22].mxu0 }
 0x2d9   : > { %v1327_v36 = vmax.f32 %v1900_v35, 0.0  ;;  %v1191_v37 = vpop.f32.mrb[23].mxu0 }
 0x2da   : > { %v1326_v38 = vmax.f32 %v1191_v37, 0.0 }
 0x2db   : > { %1359 = vst.msk [vmem:[%s2547_s10 + $0x38] sm:$0xff] %vm707_vm2, %v1327_v36 }
 0x2dc   : > { %1358 = vst.msk [vmem:[%s2547_s10 + $0x30] sm:$0xff] %vm707_vm2, %v1326_v38  ;;  %v1903_v39 = vpop.f32.mrb[24].mxu0 }
 0x2dd   : > { %v1329_v40 = vmax.f32 %v1903_v39, 0.0  ;;  %v1201_v41 = vpop.f32.mrb[25].mxu0 }
 0x2de   : > { %v1328_v42 = vmax.f32 %v1201_v41, 0.0 }
 0x2df   : > { %1361 = vst.msk [vmem:[%s2547_s10 + $0x48] sm:$0xff] %vm707_vm2, %v1329_v40 }
 0x2e0   : > { %1360 = vst.msk [vmem:[%s2547_s10 + $0x40] sm:$0xff] %vm707_vm2, %v1328_v42  ;;  %v1906_v43 = vpop.f32.mrb[26].mxu0 }
 0x2e1   : > { %v1331_v44 = vmax.f32 %v1906_v43, 0.0  ;;  %v1211_v45 = vpop.f32.mrb[27].mxu0 }
 0x2e2   : > { %v1330_v46 = vmax.f32 %v1211_v45, 0.0 }
 0x2e3   : > { %1363 = vst.msk [vmem:[%s2547_s10 + $0x58] sm:$0xff] %vm707_vm2, %v1331_v44 }
 0x2e4   : > { %1362 = vst.msk [vmem:[%s2547_s10 + $0x50] sm:$0xff] %vm707_vm2, %v1330_v46  ;;  %v1909_v47 = vpop.f32.mrb[28].mxu0 }
 0x2e5   : > { %v1333_v48 = vmax.f32 %v1909_v47, 0.0  ;;  %v1221_v49 = vpop.f32.mrb[29].mxu0 }
 0x2e6   : > { %v1332_v50 = vmax.f32 %v1221_v49, 0.0 }
 0x2e7   : > { %1365 = vst.msk [vmem:[%s2547_s10 + $0x68] sm:$0xff] %vm707_vm2, %v1333_v48 }
 0x2e8   : > { %1364 = vst.msk [vmem:[%s2547_s10 + $0x60] sm:$0xff] %vm707_vm2, %v1332_v50  ;;  %v1912_v51 = vpop.f32.mrb[30].mxu0 }
 0x2e9   : > { %v1335_v52 = vmax.f32 %v1912_v51, 0.0  ;;  %v1231_v53 = vpop.f32.mrb[31].mxu0 }
 0x2ea   : > { %v1334_v54 = vmax.f32 %v1231_v53, 0.0 }
 0x2eb   : > { %1367 = vst.msk [vmem:[%s2547_s10 + $0x78] sm:$0xff] %vm707_vm2, %v1335_v52 }
 0x2ec   : > { %1366 = vst.msk [vmem:[%s2547_s10 + $0x70] sm:$0xff] %vm707_vm2, %v1334_v54  ;;  %v1915_v55 = vpop.f32.mrb[32].mxu0 }
 0x2ed   : > { %v1337_v56 = vmax.f32 %v1915_v55, 0.0  ;;  %v1241_v57 = vpop.f32.mrb[33].mxu0 }
 0x2ee   : > { %v1336_v58 = vmax.f32 %v1241_v57, 0.0 }
 0x2ef   : > { %1369 = vst.msk [vmem:[%s2547_s10 + $0x88] sm:$0xff] %vm707_vm2, %v1337_v56 }
 0x2f0   : > { %1368 = vst.msk [vmem:[%s2547_s10 + $0x80] sm:$0xff] %vm707_vm2, %v1336_v58  ;;  %v1918_v59 = vpop.f32.mrb[34].mxu0 }
 0x2f1   : > { %v1339_v60 = vmax.f32 %v1918_v59, 0.0  ;;  %v1251_v61 = vpop.f32.mrb[35].mxu0 }
 0x2f2   : > { %v1338_v62 = vmax.f32 %v1251_v61, 0.0 }
 0x2f3   : > { %1371 = vst.msk [vmem:[%s2547_s10 + $0x98] sm:$0xff] %vm707_vm2, %v1339_v60 }
 0x2f4   : > { %1370 = vst.msk [vmem:[%s2547_s10 + $0x90] sm:$0xff] %vm707_vm2, %v1338_v62  ;;  %v1921_v63 = vpop.f32.mrb[36].mxu0 }
 0x2f5   : > { %v1341_v0 = vmax.f32 %v1921_v63, 0.0  ;;  %v1261_v1 = vpop.f32.mrb[37].mxu0 }
 0x2f6   : > { %v1340_v2 = vmax.f32 %v1261_v1, 0.0 }
 0x2f7   : > { %1373 = vst.msk [vmem:[%s2547_s10 + $0xa8] sm:$0xff] %vm707_vm2, %v1341_v0 }
 0x2f8   : > { %1372 = vst.msk [vmem:[%s2547_s10 + $0xa0] sm:$0xff] %vm707_vm2, %v1340_v2  ;;  %v1924_v4 = vpop.f32.mrb[38].mxu0 }
 0x2f9   : > { %v1343_v5 = vmax.f32 %v1924_v4, 0.0  ;;  %v1271_v6 = vpop.f32.mrb[39].mxu0 }
 0x2fa   : > { %v1342_v7 = vmax.f32 %v1271_v6, 0.0 }
 0x2fb   : > { %1375 = vst.msk [vmem:[%s2547_s10 + $0xb8] sm:$0xff] %vm707_vm2, %v1343_v5 }
 0x2fc   : > { %1374 = vst.msk [vmem:[%s2547_s10 + $0xb0] sm:$0xff] %vm707_vm2, %v1342_v7  ;;  %v1927_v8 = vpop.f32.mrb[40].mxu0 }
 0x2fd   : > { %v1345_v9 = vmax.f32 %v1927_v8, 0.0  ;;  %v1281_v10 = vpop.f32.mrb[41].mxu0 }
 0x2fe   : > { %v1344_v11 = vmax.f32 %v1281_v10, 0.0 }
 0x2ff   : > { %1377 = vst.msk [vmem:[%s2547_s10 + $0xc8] sm:$0xff] %vm707_vm2, %v1345_v9 }
 0x300   : > { %1376 = vst.msk [vmem:[%s2547_s10 + $0xc0] sm:$0xff] %vm707_vm2, %v1344_v11  ;;  %v1930_v12 = vpop.f32.mrb[42].mxu0 }
 0x301   : > { %v1347_v13 = vmax.f32 %v1930_v12, 0.0  ;;  %v1291_v14 = vpop.f32.mrb[43].mxu0 }
 0x302   : > { %v1346_v3 = vmax.f32 %v1291_v14, 0.0 }
 0x303   : > { %1379 = vst.msk [vmem:[%s2547_s10 + $0xd8] sm:$0xff] %vm707_vm2, %v1347_v13 }
 0x304   : > { %1378 = vst.msk [vmem:[%s2547_s10 + $0xd0] sm:$0xff] %vm707_vm2, %v1346_v3  ;;  %v1933_v15 = vpop.f32.mrb[44].mxu0 }
 0x305   : > { %v1349_v16 = vmax.f32 %v1933_v15, 0.0  ;;  %v1301_v17 = vpop.f32.mrb[45].mxu0 }
 0x306   : > { %v1348_v18 = vmax.f32 %v1301_v17, 0.0 }
 0x307   : > { %1381 = vst.msk [vmem:[%s2547_s10 + $0xe8] sm:$0xff] %vm707_vm2, %v1349_v16 }
 0x308   : > { %1380 = vst.msk [vmem:[%s2547_s10 + $0xe0] sm:$0xff] %vm707_vm2, %v1348_v18  ;;  %v1936_v19 = vpop.f32.mrb[48].mxu1 }
 0x309   : > { %v1351_v20 = vmax.f32 %v1936_v19, 0.0  ;;  %v1311_v21 = vpop.f32.mrb[49].mxu1 }
 0x30a   : > { %v1350_v22 = vmax.f32 %v1311_v21, 0.0 }
 0x30b   : > { %1383 = vst.msk [vmem:[%s2547_s10 + $0xf8] sm:$0xff] %vm707_vm2, %v1351_v20 }
 0x30c   : > { %1382 = vst.msk [vmem:[%s2547_s10 + $0xf0] sm:$0xff] %vm707_vm2, %v1350_v22 }
 0x30d   : > { %2082 = shalt.err (!%p2079_p10)
}
 0x30e   : > { %s2083_s19 = scalar_lea.hbm %s2614_s12, 4096  ;;  %s2087_s18 = scalar_lea.hbm %s2672_s6, 8192 }
 0x30f   : > { %p2084_p11 = scmp.ne.s32.totalorder %s2614_s12, %s2083_s19  ;;  %p2088_p0 = scmp.lt.u32.totalorder %s2614_s12, %s2672_s6 }
 0x310   : > { %p2089_p1 = scmp.lt.u32.totalorder %s2087_s18, %s2083_s19  ;;  %p2091_p3 = scmp.lt.u32.totalorder %s2083_s19, %s2614_s12 }
 0x311   : > { %p2085_p12 = pnand %p2084_p11, %p2214_p5 }
 0x312   : > { %p2090_p2 = por %p2089_p1, %p2088_p0 }
 0x313   : > { %p2086_p13 = pneg %p2085_p12 }
 0x314   : > { %p2092_p4 = por %p2091_p3, %p2090_p2 }
 0x316   : > { %p2093_p7 = pnand %p2092_p4, %p2086_p13 }
 0x318   : > { %2096 = shalt.err (!%p2093_p7)
}
 0x319   : > { %1996 = dma.vmem_to_hbm [thread:$0]  (%p2214_p5), %s2616_s26, 4096, %s2614_s12, %s1390_s25, %s2138_s20, %s2138_s20, %s2139_s29  }
 0x31a PF: > { %p2006_p8 = scmp.ge.s32.totalorder %s2135_s24, 2  ;;  %s1434_s13 = sand.u32 1, %s2123_s21  }
 0x31b   : > { %s1435_s15 = scalar_lea.sflag [#allocation3], %s1434_s13 }
 0x31c   : > { %p2000_p9 = pnand %p2006_p8, %p2218_p6 }
 0x31e   : > { %2114 = dma.done.wait (!%p2000_p9), %s1435_s15, 2048  }
 0x31f   : > { %2116 = vsyncadd (!%p2000_p9), %s1435_s15, 4294965248  ;;  %s1444_s7 = scalar_lea.sflag [#allocation5], %s1434_s13 }
 0x320   : > { %2118 = dma.done.wait (!%p2000_p9), %s1444_s7, 4096  }
 0x321   : > { %2120 = vsyncadd (!%p2000_p9), %s1444_s7, 4294963200  ;;  %p20_p5 = scmp.ge.s32.totalorder %s2201_s27, 4   ;;  %s2675_s21 = smov %s2127_s22 }
 0x322   : > { %s2676_s22 = smov %s2131_s23  ;;  %s2677_s23 = smov %s2212_s30 }
 0x323   : > { %s2678_s24 = smov %s2201_s27  ;;  %22 = sbr.rel (!%p20_p5) target bundleno = 5 (0x5), region = 95 }
 0x32a   :  { %1449 = vsyncpa [#allocation3], 1 }
 0x32b   :  { %1451 = vsyncpa [#allocation3 + $0x1], 1 }
 0x32c   :  { %1452 = vsyncpa [#allocation5], 1 }
 0x32d   :  { %1454 = vsyncpa [#allocation5 + $0x1], 1 }

</bundles_post_ra>
